<compile_context>
chip_gen: v7x
topology: tpu7x:2x2x1
jax: 0.10.0
libtpu: 0.0.40
codegen_flags: <defaults>
</compile_context>

<pallas_src>
import jax
import jax.numpy as jnp
from jax.experimental import pallas as pl
from jax.experimental.pallas import tpu as pltpu


def _round_up(v, m):
    return ((v + m - 1) // m) * m


def _tpu_info():
    try:
        return pltpu.get_tpu_info()
    except Exception:
        return None


def _vmem_capacity_bytes(info):
    if info is not None:
        for name in ("vmem_capacity_bytes", "vmem_bytes", "vmem_size_bytes"):
            v = getattr(info, name, None)
            if v:
                try:
                    return int(v)
                except Exception:
                    pass
    # Conservative default: v7x per-TensorCore VMEM (smallest of current gens).
    return 64 * 1024 * 1024


def _num_tensorcores(info):
    if info is not None:
        for name in ("num_tensorcores", "tensorcores_per_chip",
                     "num_cores_per_chip", "cores_per_chip"):
            v = getattr(info, name, None)
            if v:
                try:
                    return int(v)
                except Exception:
                    pass
    # Conservative default: assume 1 TC, i.e. never force an extra grid step.
    return 1


def excitation_kernel(w_ref, x_ref, o_ref):
    # w_ref: (1, TN) row (resident across the inner batch axis),
    # x_ref / o_ref: (TB, TN).  Sublane-broadcast multiply on the VPU.
    o_ref[...] = (w_ref[...] * x_ref[...]).astype(o_ref.dtype)


def excitation_block(w, x, *, max_tb=1024, max_tn=2048,
                     vmem_budget_bytes=None, small_input_bytes=256 * 1024,
                     force_pallas=False):
    """w: (1, N), x: (..., N) -> broadcast(w * x), matching torch.mul(w, x)."""
    N = x.shape[-1]
    assert w.shape == (1, N), f"expected w shape (1, {N}), got {w.shape}"

    out_dtype = jnp.promote_types(w.dtype, x.dtype)
    final_shape = jnp.broadcast_shapes(w.shape, x.shape)

    x2 = x.reshape(-1, N)
    B = x2.shape[0]

    x_item = jnp.dtype(x2.dtype).itemsize
    w_item = jnp.dtype(w.dtype).itemsize
    o_item = jnp.dtype(out_dtype).itemsize

    # ---- small-input fast path: let XLA do (and fuse) the single multiply. ----
    if not force_pallas and B * N * (x_item + o_item) <= small_input_bytes:
        return (w * x).reshape(final_shape)

    info = _tpu_info()
    vmem_cap = _vmem_capacity_bytes(info)
    if vmem_budget_bytes is None:
        # ~44 MiB on both 64 MiB (v7x) and 128 MiB (v5e/v6e) parts.
        vmem_budget_bytes = min(44 << 20, (vmem_cap * 11) // 16)

    # Sublane multiples per dtype: 8 (f32), 16 (bf16), 32 (int8).
    sublane_x = max(8, 32 // x_item)
    sublane_w = max(8, 32 // w_item)

    # ---- lane (N) tiling: lane-dense blocks, partial last block allowed. ----
    tn = min(_round_up(N, 128), max_tn)
    grid_n = pl.cdiv(N, tn)

    # ---- batch (B) tiling: largest tile fitting the VMEM budget. ----
    # Double-buffered x tile + double-buffered out tile (promoted dtype) +
    # double-buffered sublane-padded w row.
    w_bytes = 2 * sublane_w * tn * w_item
    per_row_bytes = 2 * tn * (x_item + o_item)
    tb = max(sublane_x, (vmem_budget_bytes - w_bytes) // per_row_bytes)
    tb = max(sublane_x, (tb // sublane_x) * sublane_x)
    tb = min(tb, max_tb)
    b_ceil = _round_up(B, sublane_x)
    tb = min(tb, b_ceil)
    grid_b = pl.cdiv(B, tb)

    # Only force a 2-way batch split when the chip has >=2 TensorCores and the
    # grid would otherwise be a single point (on 1-TC chips it just adds a
    # pipeline step and shrinks the tile for nothing).
    if _num_tensorcores(info) >= 2 and grid_n * grid_b == 1 and b_ceil > sublane_x:
        tb = max(sublane_x, _round_up(pl.cdiv(b_ceil, 2), sublane_x))
        grid_b = pl.cdiv(B, tb)

    # vmem limit derived from the actual working set, with headroom under
    # physical VMEM (important on v7x's 64 MiB; harmless on 128 MiB parts).
    working_set = 2 * tb * tn * (x_item + o_item) + w_bytes
    vmem_limit = max(working_set + (4 << 20), 32 << 20)
    vmem_limit = min(vmem_limit, vmem_cap - (12 << 20))
    vmem_limit = max(vmem_limit, working_set + (1 << 20))

    # Batch axis innermost so the w row's block index only changes on the
    # outer (N) axis and the (1, tn) row stays resident across the batch loop.
    grid = (grid_n, grid_b)

    out = pl.pallas_call(
        excitation_kernel,
        out_shape=jax.ShapeDtypeStruct((B, N), out_dtype),
        grid_spec=pltpu.PrefetchScalarGridSpec(
            num_scalar_prefetch=0,
            grid=grid,
            in_specs=[
                # w: depends only on the outer (lane-tile) axis -> resident.
                pl.BlockSpec((1, tn), lambda j, i: (0, j)),
                # x: one (tb, tn) tile per grid step; edge blocks are partial.
                pl.BlockSpec((tb, tn), lambda j, i: (i, j)),
            ],
            out_specs=pl.BlockSpec((tb, tn), lambda j, i: (i, j)),
        ),
        compiler_params=pltpu.CompilerParams(
            dimension_semantics=("parallel", "parallel"),
            vmem_limit_bytes=int(vmem_limit),
        ),
    )(w, x2)

    return out.reshape(final_shape)


def xavier_normal_init(key, shape, dtype=jnp.float32, gain=1.0):
    # nn.init.xavier_normal_ on a (1, size) parameter:
    #   fan_out = shape[0] = 1, fan_in = shape[1] = size
    fan_out, fan_in = shape
    std = gain * (2.0 / (fan_in + fan_out)) ** 0.5
    return std * jax.random.normal(key, shape, dtype=dtype)


if __name__ == "__main__":
    key = jax.random.PRNGKey(0)
    k_w, k_x, k_w2, k_x2, k_w3, k_x3 = jax.random.split(key, 6)

    # 1) Small, aligned case (Pallas path forced): batch=16, size=128.
    B, N = 16, 128
    w = xavier_normal_init(k_w, (1, N), dtype=jnp.float32)
    x = jax.random.normal(k_x, (B, N), dtype=jnp.float32)
    out = jax.block_until_ready(excitation_block(w, x, force_pallas=True))
    ref = w * x
    assert out.shape == ref.shape and out.dtype == ref.dtype
    assert jnp.allclose(out, ref, atol=1e-6, rtol=1e-6), "aligned mismatch"

    # Same inputs through the default (small-input XLA fast) path.
    out_fast = jax.block_until_ready(excitation_block(w, x))
    assert jnp.allclose(out_fast, ref, atol=1e-6, rtol=1e-6), "fast-path mismatch"

    # 2) Ragged / unaligned case exercises partial edge blocks: 13 x 100.
    B2, N2 = 13, 100
    w2 = xavier_normal_init(k_w2, (1, N2), dtype=jnp.float32)
    x2 = jax.random.normal(k_x2, (B2, N2), dtype=jnp.float32)
    out2 = jax.block_until_ready(excitation_block(w2, x2, force_pallas=True))
    ref2 = w2 * x2
    assert out2.shape == ref2.shape
    assert jnp.allclose(out2, ref2, atol=1e-6, rtol=1e-6), "ragged mismatch"

    # 3) Leading batch dims + mixed dtypes (bf16 x, f32 w -> f32 out).
    B3a, B3b, N3 = 2, 4, 32
    w3 = xavier_normal_init(k_w3, (1, N3), dtype=jnp.float32)
    x3 = jax.random.normal(k_x3, (B3a, B3b, N3), dtype=jnp.bfloat16)
    out3 = jax.block_until_ready(excitation_block(w3, x3, force_pallas=True))
    ref3 = w3 * x3
    assert out3.shape == ref3.shape and out3.dtype == ref3.dtype
    assert jnp.allclose(out3, ref3, atol=1e-3, rtol=1e-3), "mixed-dtype mismatch"

    print("KERNEL_OK")
</pallas_src>

<mosaic_0001>
module attributes {stable_mosaic.version = 11 : i64} {
  func.func @excitation_kernel(%arg0: i32, %arg1: i32, %arg2: memref<1x128xf32, #tpu.memory_space<vmem>>, %arg3: memref<16x128xf32, #tpu.memory_space<vmem>>, %arg4: memref<16x128xf32, #tpu.memory_space<vmem>>) attributes {dimension_semantics = [#tpu.dimension_semantics<parallel>, #tpu.dimension_semantics<parallel>], iteration_bounds = array<i64: 1, 1>, scalar_prefetch = 0 : i64, scratch_operands = 0 : i64, tpu.core_type = #tpu.core_type<tc>, window_params = [{transform_indices = @transform_0, window_bounds = array<i64: 1, 128>}, {transform_indices = @transform_1, window_bounds = array<i64: 16, 128>}, {transform_indices = @transform_2, window_bounds = array<i64: 16, 128>}]} {
    %c0 = arith.constant 0 : index
    %c0_0 = arith.constant 0 : index
    %0 = vector.load %arg2[%c0, %c0_0] : memref<1x128xf32, #tpu.memory_space<vmem>>, vector<1x128xf32>
    %c0_1 = arith.constant 0 : index
    %c0_2 = arith.constant 0 : index
    %1 = vector.load %arg3[%c0_1, %c0_2] : memref<16x128xf32, #tpu.memory_space<vmem>>, vector<16x128xf32>
    %2 = vector.broadcast %0 : vector<1x128xf32> to vector<16x128xf32>
    %3 = arith.mulf %2, %1 : vector<16x128xf32>
    %c0_3 = arith.constant 0 : index
    %c0_4 = arith.constant 0 : index
    %4 = vector.load %arg4[%c0_3, %c0_4] : memref<16x128xf32, #tpu.memory_space<vmem>>, vector<16x128xf32>
    tpu.vector_store %arg4[%c0_3, %c0_4], %3 {strides = array<i32>} : memref<16x128xf32, #tpu.memory_space<vmem>>, vector<16x128xf32>,
    return
  }
  func.func @transform_0(%arg0: i32, %arg1: i32) -> (i32, i32) {
    %c0_i32 = arith.constant 0 : i32
    %c0_i32_0 = arith.constant 0 : i32
    return %c0_i32, %arg0 : i32, i32
  }
  func.func @transform_1(%arg0: i32, %arg1: i32) -> (i32, i32) {
    %c0_i32 = arith.constant 0 : i32
    return %arg1, %arg0 : i32, i32
  }
  func.func @transform_2(%arg0: i32, %arg1: i32) -> (i32, i32) {
    %c0_i32 = arith.constant 0 : i32
    return %arg1, %arg0 : i32, i32
  }
}

</mosaic_0001>

<bundles_post_ra>
// kernel: tpu_custom_call.1
= control target key start
LH: loop header
LB: loop body
LE: loop exit
PB: predicated region body
PF: predicated region fallthrough
CT: control target
= control target key end

     0   :  { %7 = vsyncpa [#allocation3], 0  ;;  %s216_s0 = inlined_call_operand.hbm [shape: f32[1,128], index: 0, kind: input, shape index: {}]   ;;  %s217_s1 = inlined_call_operand.hbm [shape: f32[16,128], index: 1, kind: input, shape index: {}]   ;;  %s218_s2 = inlined_call_operand.hbm [shape: f32[16,128], index: 2, kind: output, shape index: {}]  }
   0x1   :  { %8 = vsyncpa [#allocation6], 0 }
   0x2   :  { %9 = vsyncpa [#allocation4], 0  ;;  %s147_s9 = smov [#allocation2]   ;;  %s148_s11 = smov [#allocation5]  }
   0x3   :  { %s16_s10 = sshll.u32 %s147_s9, 4  ;;  %s25_s12 = sshll.u32 %s148_s11, 4  ;;  %s17_s10 = int_to_ptr.vmem [resolvable:$true] %s16_s10  ;;  %s167_s12 = int_to_ptr.vmem [resolvable:$true] %s25_s12 }
   0x4   :  { %s75_s15 = scalar_lea.hbm %s216_s0, 16 }
   0x5   :  { %p76_p0 = scmp.ne.s32.totalorder %s216_s0, %s75_s15  ;;  %p79_p1 = scmp.lt.u32.totalorder %s75_s15, %s216_s0 }
   0x7   :  { %p81_p2 = pnand %p79_p1, %p76_p0 }
   0x9   :  { %84 = shalt.err (!%p81_p2)
}
   0xa   :  { %s85_s20 = scalar_lea.vmem %s17_s10, 16  ;;  %s89_s21 = scalar_lea.vmem %s17_s10, 32 }
   0xb   :  { %p86_p3 = scmp.ne.s32.totalorder %s17_s10, %s85_s20  ;;  %p90_p4 = scmp.lt.s32.totalorder %s17_s10, %s17_s10 }
   0xc   :  { %p91_p5 = scmp.lt.s32.totalorder %s89_s21, %s85_s20 }
   0xe   :  { %p92_p6 = por %p91_p5, %p90_p4 }
  0x10   :  { %p93_p7 = pnand %p92_p6, %p86_p3 }
  0x12   :  { %96 = shalt.err (!%p93_p7)
}
  0x13   :  { %19 = dma.hbm_to_vmem [thread:$0]  %s216_s0, 16, %s17_s10, [#allocation3]  }
  0x14   :  { %s97_s26 = scalar_lea.hbm %s217_s1, 256 }
  0x15   :  { %p98_p8 = scmp.ne.s32.totalorder %s217_s1, %s97_s26  ;;  %p101_p9 = scmp.lt.u32.totalorder %s97_s26, %s217_s1 }
  0x17   :  { %p103_p10 = pnand %p101_p9, %p98_p8 }
  0x19   :  { %106 = shalt.err (!%p103_p10)
}
  0x1a   :  { %s107_s3 = scalar_lea.vmem %s167_s12, 256  ;;  %p112_p12 = scmp.lt.s32.totalorder %s167_s12, %s167_s12 }
  0x1b   :  { %p108_p11 = scmp.ne.s32.totalorder %s167_s12, %s107_s3  ;;  %p113_p13 = scmp.lt.s32.totalorder %s107_s3, %s107_s3 }
  0x1d   :  { %p114_p0 = por %p113_p13, %p112_p12 }
  0x1f   :  { %p115_p1 = pnand %p114_p0, %p108_p11 }
  0x21   :  { %118 = shalt.err (!%p115_p1)
}
  0x22   :  { %s149_s0 = smov 128   ;;  %s150_s4 = smov 8  }
  0x23   :  { %31 = dma.hbm_to_vmem [thread:$0]  %s217_s1, 256, %s167_s12, [#allocation6], %s149_s0, %s149_s0, %s150_s4  }
  0x24   :  { %141 = dma.done.wait [#allocation3], 16  }
  0x25   :  { %142 = vsyncadd [#allocation3], 4294967280 }
  0x26   :  { %143 = dma.done.wait [#allocation6], 256  }
  0x27   :  { %144 = vsyncadd [#allocation6], 4294967040  ;;  %s151_s7 = smov [#allocation7]   ;;  %v69_v0 = vld [vmem:[#allocation2] ss:$0 sm:$0xff]  ;;  %v39_v1 = vld [vmem:[#allocation5] sm:$0xff] }
  0x28   :  { %s56_s8 = sshll.u32 %s151_s7, 4  ;;  %v40_v2 = vld [vmem:[#allocation5 + $0x8] sm:$0xff]  ;;  %v47_v3 = vmul.f32 %v69_v0, %v39_v1  ;;  %s57_s8 = int_to_ptr.vmem [resolvable:$true] %s56_s8 }
  0x29   :  { %v48_v4 = vmul.f32 %v69_v0, %v40_v2  ;;  %s119_s9 = scalar_lea.vmem %s57_s8, 256  ;;  %p124_p3 = scmp.lt.s32.totalorder %s57_s8, %s57_s8 }
  0x2a   :  { %49 = vst [vmem:[#allocation7] sm:$0xff] %v47_v3  ;;  %p120_p2 = scmp.ne.s32.totalorder %s57_s8, %s119_s9  ;;  %p125_p4 = scmp.lt.s32.totalorder %s119_s9, %s119_s9 }
  0x2b   :  { %50 = vst [vmem:[#allocation7 + $0x8] sm:$0xff] %v48_v4 }
  0x2c   :  { %p126_p5 = por %p125_p4, %p124_p3 }
  0x2e   :  { %p127_p6 = pnand %p126_p5, %p120_p2 }
  0x30   :  { %130 = shalt.err (!%p127_p6)
}
  0x31   :  { %s131_s11 = scalar_lea.hbm %s218_s2, 256 }
  0x32   :  { %p132_p7 = scmp.ne.s32.totalorder %s218_s2, %s131_s11  ;;  %p135_p8 = scmp.lt.u32.totalorder %s131_s11, %s218_s2 }
  0x34   :  { %p137_p9 = pnand %p135_p8, %p132_p7 }
  0x36   :  { %140 = shalt.err (!%p137_p9)
}
  0x37   :  { %62 = dma.vmem_to_hbm [thread:$0]  %s57_s8, 256, %s218_s2, [#allocation4], %s149_s0, %s149_s0, %s150_s4  }
  0x38   :  { %145 = dma.done.wait [#allocation4], 256  }
  0x39   :  { %146 = vsyncadd [#allocation4], 4294967040 }
  0x3a   :  { %66 = vsyncpa [#allocation3], 1 }
  0x3b   :  { %67 = vsyncpa [#allocation6], 1 }
  0x3c   :  { %68 = vsyncpa [#allocation4], 1 }

</bundles_post_ra>
